<compile_context>
chip_gen: v5e
topology: v5e:2x2
jax: 0.10.0
libtpu: 0.0.40
codegen_flags: <defaults>
</compile_context>

<pallas_src>
import functools

import jax
import jax.numpy as jnp
from jax.experimental import pallas as pl
from jax.experimental.pallas import tpu as pltpu


IN_DIM = 28 * 28       # 784
HID = 128
OUT_DIM = 10
OUT_PAD = 128          # lane-dense padded logits width
MAX_TILE_M = 512       # upper bound on batch tile (rows per grid step)


def _round_up(x, m):
    return (x + m - 1) // m * m


def _pick_tile_m(rows):
    """Multiple of 8, <= 512, and (when rows > 8) gives >= 2 grid steps."""
    return max(8, min(MAX_TILE_M, _round_up(pl.cdiv(rows, 2), 8)))


# ---------------------------------------------------------------------------
# Fused MLP kernel: (TILE_M, 784) bf16 tile -> (TILE_M, 128) f32 padded logits
# ---------------------------------------------------------------------------
def _fused_mlp_kernel(x_ref, w1_ref, b1_ref, w2_ref, b2_ref, w3_ref, b3_ref,
                      o_ref, *, total_rows, tile_m, mask_rows):
    x = x_ref[...]                                                 # (TM,784) bf16
    # fc1 + ReLU  (bf16 MXU, f32 accumulate, f32 epilogue)
    h = jnp.dot(x, w1_ref[...], preferred_element_type=jnp.float32)
    h = jnp.maximum(h + b1_ref[...], 0.0)                          # (TM,128) f32
    # fc2 + ReLU
    h = jnp.dot(h.astype(jnp.bfloat16), w2_ref[...],
                preferred_element_type=jnp.float32)
    h = jnp.maximum(h + b2_ref[...], 0.0)                          # (TM,128) f32
    # fc3 (padded to 128 lanes; pad columns/bias are zero)
    out = jnp.dot(h.astype(jnp.bfloat16), w3_ref[...],
                  preferred_element_type=jnp.float32)
    out = out + b3_ref[...]                                        # (TM,128) f32

    if mask_rows:
        # Belt-and-braces: zero rows beyond the real batch in the ragged last
        # block (their OOB input data is unspecified; writes are discarded
        # anyway, this just makes behavior deterministic).
        row = pl.program_id(0) * tile_m + jax.lax.broadcasted_iota(
            jnp.int32, out.shape, 0)
        out = jnp.where(row < total_rows, out, 0.0)

    o_ref[...] = out.astype(o_ref.dtype)


def _fused_mlp(xb, w1t, b1, w2t, b2, w3t, b3):
    """xb: (rows, 784) bf16 with rows >= 8. Returns (rows, OUT_PAD) f32."""
    rows = xb.shape[0]
    tile_m = _pick_tile_m(rows)
    grid = (pl.cdiv(rows, tile_m),)
    mask_rows = (rows % tile_m) != 0

    kernel = functools.partial(_fused_mlp_kernel, total_rows=rows,
                               tile_m=tile_m, mask_rows=mask_rows)

    # Constant index_map -> block fetched once, revisited every grid step.
    full = lambda shape: pl.BlockSpec(shape, lambda i: (0, 0))
    grid_spec = pltpu.PrefetchScalarGridSpec(
        num_scalar_prefetch=0,
        grid=grid,
        in_specs=[
            pl.BlockSpec((tile_m, IN_DIM), lambda i: (i, 0)),   # x tile (bf16)
            full((IN_DIM, HID)),                                # w1^T (bf16)
            full((1, HID)),                                     # b1   (f32)
            full((HID, HID)),                                   # w2^T (bf16)
            full((1, HID)),                                     # b2   (f32)
            full((HID, OUT_PAD)),                               # w3^T (bf16, padded)
            full((1, OUT_PAD)),                                 # b3   (f32, padded)
        ],
        out_specs=pl.BlockSpec((tile_m, OUT_PAD), lambda i: (i, 0)),
    )
    return pl.pallas_call(
        kernel,
        out_shape=jax.ShapeDtypeStruct((rows, OUT_PAD), jnp.float32),
        grid_spec=grid_spec,
        compiler_params=pltpu.CompilerParams(
            dimension_semantics=("parallel",)),
    )(xb, w1t, b1, w2t, b2, w3t, b3)


# ---------------------------------------------------------------------------
# Parameters (PyTorch nn.Linear layout + deterministic uniform fan-in init)
# ---------------------------------------------------------------------------
def init_params(key):
    ks = jax.random.split(key, 6)

    def u(k, shape, fan_in):
        bound = 1.0 / jnp.sqrt(jnp.float32(fan_in))
        return jax.random.uniform(k, shape, jnp.float32, -bound, bound)

    return {
        "fc1_w": u(ks[0], (HID, IN_DIM), IN_DIM),   # (out, in) like torch
        "fc1_b": u(ks[1], (HID,), IN_DIM),
        "fc2_w": u(ks[2], (HID, HID), HID),
        "fc2_b": u(ks[3], (HID,), HID),
        "fc3_w": u(ks[4], (OUT_DIM, HID), HID),
        "fc3_b": u(ks[5], (OUT_DIM,), HID),
    }


def prepare_params(params):
    """One-time: transpose to (in, out), pad fc3 to 128 lanes, cast to bf16."""
    w3t = params["fc3_w"].T                                    # (128, 10)
    w3t_pad = jnp.pad(w3t, ((0, 0), (0, OUT_PAD - OUT_DIM)))   # (128, 128)
    b3_pad = jnp.pad(params["fc3_b"], (0, OUT_PAD - OUT_DIM))  # (128,)
    return {
        "w1t": params["fc1_w"].T.astype(jnp.bfloat16),         # (784, 128)
        "b1": params["fc1_b"].reshape(1, HID).astype(jnp.float32),
        "w2t": params["fc2_w"].T.astype(jnp.bfloat16),         # (128, 128)
        "b2": params["fc2_b"].reshape(1, HID).astype(jnp.float32),
        "w3t": w3t_pad.astype(jnp.bfloat16),                   # (128, 128)
        "b3": b3_pad.reshape(1, OUT_PAD).astype(jnp.float32),
    }


# ---------------------------------------------------------------------------
# Forward pass (matches OurFC.forward)
# ---------------------------------------------------------------------------
@jax.jit
def our_fc_forward(prep, x):
    B = x.shape[0]
    xf = x.reshape(B, -1)                      # x.view(B, -1)
    assert xf.shape[1] == IN_DIM
    xb = xf.astype(jnp.bfloat16)               # halve x HBM traffic
    if B < 8:                                  # tiny pad to 8-sublane minimum
        xb = jnp.pad(xb, ((0, 8 - B), (0, 0)))
    out_pad = _fused_mlp(xb, prep["w1t"], prep["b1"], prep["w2t"], prep["b2"],
                         prep["w3t"], prep["b3"])              # (rows, 128) f32
    return out_pad[:B, :OUT_DIM]               # drop padded rows + padded lanes


# ---------------------------------------------------------------------------
# Pure-JAX reference emulating the same bf16 operand / f32 accumulate numerics
# ---------------------------------------------------------------------------
def ref_forward(params, x):
    bf = jnp.bfloat16
    xf = x.reshape(x.shape[0], -1)
    h = jnp.dot(xf.astype(bf), params["fc1_w"].T.astype(bf),
                preferred_element_type=jnp.float32) + params["fc1_b"]
    h = jnp.maximum(h, 0.0)
    h = jnp.dot(h.astype(bf), params["fc2_w"].T.astype(bf),
                preferred_element_type=jnp.float32) + params["fc2_b"]
    h = jnp.maximum(h, 0.0)
    out = jnp.dot(h.astype(bf), params["fc3_w"].T.astype(bf),
                  preferred_element_type=jnp.float32) + params["fc3_b"]
    return out


if __name__ == "__main__":
    key = jax.random.PRNGKey(0)
    pkey, xkey = jax.random.split(key)
    params = init_params(pkey)
    prep = prepare_params(params)

    x = jax.random.normal(xkey, (2, 1, 28, 28), jnp.float32)
    out = our_fc_forward(prep, x)
    jax.block_until_ready(out)

    ref = ref_forward(params, x)

    assert out.shape == (2, 10) and out.dtype == jnp.float32
    assert bool(jnp.all(jnp.isfinite(out)))
    assert bool(jnp.allclose(out, ref, rtol=1e-2, atol=1e-2))
    print("KERNEL_OK")
</pallas_src>

<mosaic_0001>
module attributes {stable_mosaic.version = 11 : i64} {
  func.func @_fused_mlp_kernel(%arg0: i32, %arg1: memref<8x784xbf16, #tpu.memory_space<vmem>>, %arg2: memref<784x128xbf16, #tpu.memory_space<vmem>>, %arg3: memref<1x128xf32, #tpu.memory_space<vmem>>, %arg4: memref<128x128xbf16, #tpu.memory_space<vmem>>, %arg5: memref<1x128xf32, #tpu.memory_space<vmem>>, %arg6: memref<128x128xbf16, #tpu.memory_space<vmem>>, %arg7: memref<1x128xf32, #tpu.memory_space<vmem>>, %arg8: memref<8x128xf32, #tpu.memory_space<vmem>>) attributes {dimension_semantics = [#tpu.dimension_semantics<parallel>], iteration_bounds = array<i64: 1>, scalar_prefetch = 0 : i64, scratch_operands = 0 : i64, tpu.core_type = #tpu.core_type<tc>, window_params = [{transform_indices = @transform_0, window_bounds = array<i64: 8, 784>}, {pipeline_mode = #tpu.pipeline_mode<synchronous>, transform_indices = @transform_1, window_bounds = array<i64: 784, 128>}, {pipeline_mode = #tpu.pipeline_mode<synchronous>, transform_indices = @transform_2, window_bounds = array<i64: 1, 128>}, {pipeline_mode = #tpu.pipeline_mode<synchronous>, transform_indices = @transform_3, window_bounds = array<i64: 128, 128>}, {pipeline_mode = #tpu.pipeline_mode<synchronous>, transform_indices = @transform_4, window_bounds = array<i64: 1, 128>}, {pipeline_mode = #tpu.pipeline_mode<synchronous>, transform_indices = @transform_5, window_bounds = array<i64: 128, 128>}, {pipeline_mode = #tpu.pipeline_mode<synchronous>, transform_indices = @transform_6, window_bounds = array<i64: 1, 128>}, {transform_indices = @transform_7, window_bounds = array<i64: 8, 128>}]} {
    %c0 = arith.constant 0 : index
    %c0_0 = arith.constant 0 : index
    %0 = vector.load %arg1[%c0, %c0_0] : memref<8x784xbf16, #tpu.memory_space<vmem>>, vector<8x784xbf16>
    %c0_1 = arith.constant 0 : index
    %c0_2 = arith.constant 0 : index
    %1 = vector.load %arg2[%c0_1, %c0_2] : memref<784x128xbf16, #tpu.memory_space<vmem>>, vector<784x128xbf16>
    %cst = arith.constant dense<0.000000e+00> : vector<8x128xf32>
    %2 = tpu.matmul %0, %1, %cst {dimension_numbers = #tpu.dot_dimension_numbers<[1], [0], [0], [1], [0, 0, 1, 1], [], []>} : vector<8x784xbf16>, vector<784x128xbf16>, vector<8x128xf32> -> vector<8x128xf32>
    %c0_3 = arith.constant 0 : index
    %c0_4 = arith.constant 0 : index
    %3 = vector.load %arg3[%c0_3, %c0_4] : memref<1x128xf32, #tpu.memory_space<vmem>>, vector<1x128xf32>
    %4 = vector.broadcast %3 : vector<1x128xf32> to vector<8x128xf32>
    %5 = arith.addf %2, %4 : vector<8x128xf32>
    %cst_5 = arith.constant 0.000000e+00 : f32
    %6 = vector.broadcast %cst_5 : f32 to vector<8x128xf32>
    %7 = arith.maximumf %5, %6 : vector<8x128xf32>
    %8 = arith.truncf %7 : vector<8x128xf32> to vector<8x128xbf16>
    %c0_6 = arith.constant 0 : index
    %c0_7 = arith.constant 0 : index
    %9 = vector.load %arg4[%c0_6, %c0_7] : memref<128x128xbf16, #tpu.memory_space<vmem>>, vector<128x128xbf16>
    %cst_8 = arith.constant dense<0.000000e+00> : vector<8x128xf32>
    %10 = tpu.matmul %8, %9, %cst_8 {dimension_numbers = #tpu.dot_dimension_numbers<[1], [0], [0], [1], [0, 0, 1, 1], [], []>} : vector<8x128xbf16>, vector<128x128xbf16>, vector<8x128xf32> -> vector<8x128xf32>
    %c0_9 = arith.constant 0 : index
    %c0_10 = arith.constant 0 : index
    %11 = vector.load %arg5[%c0_9, %c0_10] : memref<1x128xf32, #tpu.memory_space<vmem>>, vector<1x128xf32>
    %12 = vector.broadcast %11 : vector<1x128xf32> to vector<8x128xf32>
    %13 = arith.addf %10, %12 : vector<8x128xf32>
    %cst_11 = arith.constant 0.000000e+00 : f32
    %14 = vector.broadcast %cst_11 : f32 to vector<8x128xf32>
    %15 = arith.maximumf %13, %14 : vector<8x128xf32>
    %16 = arith.truncf %15 : vector<8x128xf32> to vector<8x128xbf16>
    %c0_12 = arith.constant 0 : index
    %c0_13 = arith.constant 0 : index
    %17 = vector.load %arg6[%c0_12, %c0_13] : memref<128x128xbf16, #tpu.memory_space<vmem>>, vector<128x128xbf16>
    %cst_14 = arith.constant dense<0.000000e+00> : vector<8x128xf32>
    %18 = tpu.matmul %16, %17, %cst_14 {dimension_numbers = #tpu.dot_dimension_numbers<[1], [0], [0], [1], [0, 0, 1, 1], [], []>} : vector<8x128xbf16>, vector<128x128xbf16>, vector<8x128xf32> -> vector<8x128xf32>
    %c0_15 = arith.constant 0 : index
    %c0_16 = arith.constant 0 : index
    %19 = vector.load %arg7[%c0_15, %c0_16] : memref<1x128xf32, #tpu.memory_space<vmem>>, vector<1x128xf32>
    %20 = vector.broadcast %19 : vector<1x128xf32> to vector<8x128xf32>
    %21 = arith.addf %18, %20 : vector<8x128xf32>
    %c0_17 = arith.constant 0 : index
    %c0_18 = arith.constant 0 : index
    %22 = vector.load %arg8[%c0_17, %c0_18] : memref<8x128xf32, #tpu.memory_space<vmem>>, vector<8x128xf32>
    tpu.vector_store %arg8[%c0_17, %c0_18], %21 {strides = array<i32>} : memref<8x128xf32, #tpu.memory_space<vmem>>, vector<8x128xf32>,
    return
  }
  func.func @transform_0(%arg0: i32) -> (i32, i32) {
    %c0_i32 = arith.constant 0 : i32
    %c0_i32_0 = arith.constant 0 : i32
    return %arg0, %c0_i32 : i32, i32
  }
  func.func @transform_1(%arg0: i32) -> (i32, i32) {
    %c0_i32 = arith.constant 0 : i32
    %c0_i32_0 = arith.constant 0 : i32
    %c0_i32_1 = arith.constant 0 : i32
    return %c0_i32, %c0_i32_0 : i32, i32
  }
  func.func @transform_2(%arg0: i32) -> (i32, i32) {
    %c0_i32 = arith.constant 0 : i32
    %c0_i32_0 = arith.constant 0 : i32
    %c0_i32_1 = arith.constant 0 : i32
    return %c0_i32, %c0_i32_0 : i32, i32
  }
  func.func @transform_3(%arg0: i32) -> (i32, i32) {
    %c0_i32 = arith.constant 0 : i32
    %c0_i32_0 = arith.constant 0 : i32
    %c0_i32_1 = arith.constant 0 : i32
    return %c0_i32, %c0_i32_0 : i32, i32
  }
  func.func @transform_4(%arg0: i32) -> (i32, i32) {
    %c0_i32 = arith.constant 0 : i32
    %c0_i32_0 = arith.constant 0 : i32
    %c0_i32_1 = arith.constant 0 : i32
    return %c0_i32, %c0_i32_0 : i32, i32
  }
  func.func @transform_5(%arg0: i32) -> (i32, i32) {
    %c0_i32 = arith.constant 0 : i32
    %c0_i32_0 = arith.constant 0 : i32
    %c0_i32_1 = arith.constant 0 : i32
    return %c0_i32, %c0_i32_0 : i32, i32
  }
  func.func @transform_6(%arg0: i32) -> (i32, i32) {
    %c0_i32 = arith.constant 0 : i32
    %c0_i32_0 = arith.constant 0 : i32
    %c0_i32_1 = arith.constant 0 : i32
    return %c0_i32, %c0_i32_0 : i32, i32
  }
  func.func @transform_7(%arg0: i32) -> (i32, i32) {
    %c0_i32 = arith.constant 0 : i32
    %c0_i32_0 = arith.constant 0 : i32
    return %arg0, %c0_i32 : i32, i32
  }
}

</mosaic_0001>

<bundles_post_ra>
// kernel: our_fc_forward.1
= control target key start
LH: loop header
LB: loop body
LE: loop exit
PB: predicated region body
PF: predicated region fallthrough
CT: control target
= control target key end

     0   :  { %12 = vsyncpa [#allocation3], 0  ;;  %s1092_s27 = smov [#allocation2]   ;;  %s1093_s29 = smov 64   ;;  %s1210_s0 = inlined_call_operand.vmem [shape: bf16[8,784], index: 0, kind: input, shape index: {}]   ;;  %s1211_s1 = inlined_call_operand.hbm [shape: bf16[784,128], index: 1, kind: input, shape index: {}]   ;;  %s1212_s2 = inlined_call_operand.vmem [shape: f32[1,128], index: 2, kind: input, shape index: {}]   ;;  %s1213_s3 = inlined_call_operand.vmem [shape: bf16[128,128], index: 3, kind: input, shape index: {}]   ;;  %s1214_s4 = inlined_call_operand.vmem [shape: f32[1,128], index: 4, kind: input, shape index: {}]   ;;  %s1215_s5 = inlined_call_operand.vmem [shape: bf16[128,128], index: 5, kind: input, shape index: {}]   ;;  %s1216_s6 = inlined_call_operand.vmem [shape: f32[1,128], index: 6, kind: input, shape index: {}]   ;;  %s1217_s7 = inlined_call_operand.vmem [shape: f32[8,128], index: 7, kind: output, shape index: {}]  }
   0x1   :  { %s19_s26 = sshll.u32 %s1211_s1, 4  ;;  %s21_s28 = sshll.u32 %s1092_s27, 4  ;;  %s20_s26 = int_to_ptr.hbm [resolvable:$true] %s19_s26  ;;  %s22_s28 = int_to_ptr.vmem [resolvable:$true] %s21_s28 }
   0x2   :  { %s1094_s30 = smov 4  }
   0x3   :  { %27 = dma.hbm_to_vmem [thread:$0]  %s20_s26, 6272, %s22_s28, [#allocation3], %s1093_s29, %s1093_s29, %s1094_s30  }
   0x4   :  { %1090 = dma.done.wait [#allocation3], 6272  }
   0x5   :  { %1091 = vsyncadd [#allocation3], 4294961024  ;;  %v1002_v0 = vld [vmem:[#allocation2 + $0x38] sm:$0xff]  ;;  %v1001_v3 = vld [vmem:[#allocation2 + $0x30] sm:$0xff]  ;;  %vm467_vm0 = vcmask 130048  }
   0x6   :  { %v1010_v1 = vld [vmem:[#allocation2 + $0x78] sm:$0xff]  ;;  %471 = vmatpush.bf16.msra.mxu0 %v1002_v0  ;;  %v1009_v4 = vld [vmem:[#allocation2 + $0x70] sm:$0xff]  ;;  %v1000_v8 = vld [vmem:[#allocation2 + $0x28] sm:$0xff] }
   0x7   :  { %v1018_v2 = vld [vmem:[#allocation2 + $0xb8] sm:$0xff]  ;;  %484 = vmatpush.bf16.msra.mxu1 %v1010_v1  ;;  %v1017_v5 = vld [vmem:[#allocation2 + $0xb0] sm:$0xff]  ;;  %v1008_v9 = vld [vmem:[#allocation2 + $0x68] sm:$0xff] }
   0x8   :  { %497 = vmatpush.bf16.msra.mxu2 %v1018_v2  ;;  %v1026_v6 = vld [vmem:[#allocation2 + $0xf8] sm:$0xff]  ;;  %v1025_v7 = vld [vmem:[#allocation2 + $0xf0] sm:$0xff]  ;;  %v1016_v10 = vld [vmem:[#allocation2 + $0xa8] sm:$0xff] }
   0x9   :  { %510 = vmatpush.bf16.msra.mxu3 %v1026_v6  ;;  %v1024_v11 = vld [vmem:[#allocation2 + $0xe8] sm:$0xff]  ;;  %v999_v12 = vld [vmem:[#allocation2 + $0x20] sm:$0xff]  ;;  %v998_v16 = vld [vmem:[#allocation2 + $0x18] sm:$0xff] }
   0xa   :  { %472 = vmatpush.bf16.msra.mxu0 %v1001_v3  ;;  %v1007_v13 = vld [vmem:[#allocation2 + $0x60] sm:$0xff]  ;;  %v1006_v17 = vld [vmem:[#allocation2 + $0x58] sm:$0xff]  ;;  %v997_v20 = vld [vmem:[#allocation2 + $0x10] sm:$0xff] }
   0xb   :  { %485 = vmatpush.bf16.msra.mxu1 %v1009_v4  ;;  %v1015_v14 = vld [vmem:[#allocation2 + $0xa0] sm:$0xff]  ;;  %v1014_v18 = vld [vmem:[#allocation2 + $0x98] sm:$0xff]  ;;  %v1005_v21 = vld [vmem:[#allocation2 + $0x50] sm:$0xff] }
   0xc   :  { %498 = vmatpush.bf16.msra.mxu2 %v1017_v5  ;;  %v1023_v15 = vld [vmem:[#allocation2 + $0xe0] sm:$0xff]  ;;  %v1022_v19 = vld [vmem:[#allocation2 + $0xd8] sm:$0xff]  ;;  %v1013_v22 = vld [vmem:[#allocation2 + $0x90] sm:$0xff] }
   0xd   :  { %511 = vmatpush.bf16.msra.mxu3 %v1025_v7  ;;  %v1021_v23 = vld [vmem:[#allocation2 + $0xd0] sm:$0xff]  ;;  %v996_v24 = vld [vmem:[#allocation2 + $0x8] sm:$0xff]  ;;  %v43_v26 = vld [vmem:[%s1210_s0] sm:$0xff] }
   0xe   :  { %473 = vmatpush.bf16.msra.mxu0 %v1000_v8  ;;  %v1004_v25 = vld [vmem:[#allocation2 + $0x48] sm:$0xff]  ;;  %v153_v29 = vunpack.c.l.b16 %v43_v26  ;;  %v154_v31 = vunpack.c.h.b16 %v43_v26  ;;  %v995_v32 = vld [vmem:[#allocation2] sm:$0xff]  ;;  %v1034_v34 = vld [vmem:[#allocation2 + $0x138] sm:$0xff] }
   0xf   :  { %486 = vmatpush.bf16.msra.mxu1 %v1008_v9  ;;  %v1012_v27 = vld [vmem:[#allocation2 + $0x88] sm:$0xff]  ;;  %v1003_v33 = vld [vmem:[#allocation2 + $0x40] sm:$0xff]  ;;  %v1042_v35 = vld [vmem:[#allocation2 + $0x178] sm:$0xff] }
  0x10   :  { %499 = vmatpush.bf16.msra.mxu2 %v1016_v10  ;;  %v44_v28 = vld [vmem:[%s1210_s0 + $0x8] sm:$0xff]  ;;  %v1011_v36 = vld [vmem:[#allocation2 + $0x80] sm:$0xff]  ;;  %v160_v38 = vpack.c.b16 %v153_v29, %v153_v29  ;;  %v161_v39 = vpack.c.b16 %v154_v31, %v154_v31  ;;  %v1033_v43 = vld [vmem:[#allocation2 + $0x130] sm:$0xff] }
  0x11   :  { %512 = vmatpush.bf16.msra.mxu3 %v1024_v11  ;;  %v1020_v30 = vld [vmem:[#allocation2 + $0xc8] sm:$0xff]  ;;  %v155_v37 = vunpack.c.l.b16 %v44_v28  ;;  %v156_v40 = vunpack.c.h.b16 %v44_v28  ;;  %v1019_v41 = vld [vmem:[#allocation2 + $0xc0] sm:$0xff]  ;;  %v1041_v44 = vld [vmem:[#allocation2 + $0x170] sm:$0xff] }
  0x12   :  { %474 = vmatpush.bf16.msra.mxu0 %v999_v12  ;;  %v1043_v42 = vld [vmem:[#allocation2 + $0x180] sm:$0xff]  ;;  %v1032_v47 = vld [vmem:[#allocation2 + $0x128] sm:$0xff]  ;;  %v46_v51 = vld [vmem:[%s1210_s0 + $0x18] sm:$0xf] }
  0x13   :  { %487 = vmatpush.bf16.msra.mxu1 %v1007_v13  ;;  %v162_v45 = vpack.c.b16 %v155_v37, %v155_v37  ;;  %v163_v46 = vpack.c.b16 %v156_v40, %v156_v40  ;;  %v1040_v48 = vld [vmem:[#allocation2 + $0x168] sm:$0xff]  ;;  %v1031_v49 = vld [vmem:[#allocation2 + $0x120] sm:$0xff]  ;;  %v1030_v52 = vld [vmem:[#allocation2 + $0x118] sm:$0xff]  ;;  %v159_v54 = vunpack.c.l.b16 %v46_v51 }
  0x14   :  { %500 = vmatpush.bf16.msra.mxu2 %v1015_v14  ;;  %v1039_v50 = vld [vmem:[#allocation2 + $0x160] sm:$0xff]  ;;  %v1038_v53 = vld [vmem:[#allocation2 + $0x158] sm:$0xff]  ;;  %v1029_v55 = vld [vmem:[#allocation2 + $0x110] sm:$0xff] }
  0x15   :  { %513 = vmatpush.bf16.msra.mxu3 %v1023_v15  ;;  %v1037_v56 = vld [vmem:[#allocation2 + $0x150] sm:$0xff]  ;;  %v166_v57 = vpack.c.b16 %v159_v54, %v159_v54  ;;  %v1028_v58 = vld [vmem:[#allocation2 + $0x108] sm:$0xff]  ;;  %v1027_v63 = vld [vmem:[#allocation2 + $0x100] sm:$0xff] }
  0x16   :  { %475 = vmatpush.bf16.msra.mxu0 %v998_v16  ;;  %v1036_v59 = vld [vmem:[#allocation2 + $0x148] sm:$0xff]  ;;  %v45_v60 = vld [vmem:[%s1210_s0 + $0x10] sm:$0xff]  ;;  %v1035_v0 = vld [vmem:[#allocation2 + $0x140] sm:$0xff] }
  0x17   :  { %488 = vmatpush.bf16.msra.mxu1 %v1006_v17  ;;  %v157_v61 = vunpack.c.l.b16 %v45_v60  ;;  %v158_v62 = vunpack.c.h.b16 %v45_v60  ;;  %v1051_v3 = vld [vmem:[%s1213_s3 + $0x38] sm:$0xff]  ;;  %v1050_v4 = vld [vmem:[%s1213_s3 + $0x30] sm:$0xff]  ;;  %v1049_v5 = vld [vmem:[%s1213_s3 + $0x28] sm:$0xff] }
  0x18   :  { %501 = vmatpush.bf16.msra.mxu2 %v1014_v18  ;;  %v1048_v6 = vld [vmem:[%s1213_s3 + $0x20] sm:$0xff]  ;;  %v1047_v7 = vld [vmem:[%s1213_s3 + $0x18] sm:$0xff]  ;;  %v1046_v8 = vld [vmem:[%s1213_s3 + $0x10] sm:$0xff] }
  0x19   :  { %514 = vmatpush.bf16.msra.mxu3 %v1022_v19  ;;  %v164_v1 = vpack.c.b16 %v157_v61, %v157_v61  ;;  %v165_v2 = vpack.c.b16 %v158_v62, %v158_v62  ;;  %v1045_v9 = vld [vmem:[%s1213_s3 + $0x8] sm:$0xff]  ;;  %v1044_v12 = vld [vmem:[%s1213_s3] sm:$0xff]  ;;  %v1059_v15 = vld [vmem:[%s1215_s5 + $0x38] sm:$0xff] }
  0x1a   :  { %476 = vmatpush.bf16.msra.mxu0 %v997_v20  ;;  %v1058_v18 = vld [vmem:[%s1215_s5 + $0x30] sm:$0xff]  ;;  %v1063_v19 = vld [vmem:[%s1212_s2] ss:$0 sm:$0xff]  ;;  %v1057_v20 = vld [vmem:[%s1215_s5 + $0x28] sm:$0xff] }
  0x1b   :  { %489 = vmatpush.bf16.msra.mxu1 %v1005_v21  ;;  %v1055_v26 = vld [vmem:[%s1215_s5 + $0x18] sm:$0xff]  ;;  %v1054_v29 = vld [vmem:[%s1215_s5 + $0x10] sm:$0xff] }
  0x1c   :  { %502 = vmatpush.bf16.msra.mxu2 %v1013_v22 }
  0x1d   :  { %515 = vmatpush.bf16.msra.mxu3 %v1021_v23 }
  0x1e   :  { %477 = vmatpush.bf16.msra.mxu0 %v996_v24  ;;  %v1056_v24 = vld [vmem:[%s1215_s5 + $0x20] sm:$0xff] }
  0x1f   :  { %490 = vmatpush.bf16.msra.mxu1 %v1004_v25 }
  0x20   :  { %503 = vmatpush.bf16.msra.mxu2 %v1012_v27 }
  0x21   :  { %516 = vmatpush.bf16.msra.mxu3 %v1020_v30 }
  0x22   :  { %478 = vmatpush.bf16.msra.mxu0 %v995_v32 }
  0x23   :  { %491 = vmatpush.bf16.msra.mxu1 %v1003_v33 }
  0x24   :  { %504 = vmatpush.bf16.msra.mxu2 %v1011_v36 }
  0x25   :  { %479 = vmatmul.bf16.vlgmr.msra.gmra.mxu0 %v160_v38  ;;  %517 = vmatpush.bf16.msra.mxu3 %v1019_v41  ;;  %v1053_v41 = vld [vmem:[%s1215_s5 + $0x8] sm:$0xff] }
  0x26   :  { %523 = vmatpush.bf16.msrb.mxu0 %v1034_v34  ;;  %492 = vmatmul.bf16.vlgmr.msra.gmra.mxu1 %v161_v39 }
  0x27   :  { %536 = vmatpush.bf16.msrb.mxu1 %v1042_v35  ;;  %505 = vmatmul.bf16.vlgmr.msra.gmra.mxu2 %v162_v45 }
  0x28   :  { %556 = vmatpush.bf16.msrb.mxu2 %v1043_v42  ;;  %518 = vmatmul.bf16.vlgmr.msra.gmra.mxu3 %v163_v46  ;;  %v1052_v42 = vld [vmem:[%s1215_s5] sm:$0xff] }
  0x29   :  { %632 = vmatpush.bf16.msrb.mxu3 %v1051_v3 }
  0x2a   :  { %524 = vmatpush.bf16.msrb.mxu0 %v1033_v43  ;;  %v1064_v43 = vld [vmem:[%s1214_s4] ss:$0 sm:$0xff] }
  0x2b   :  { %537 = vmatpush.bf16.msrb.mxu1 %v1041_v44 }
  0x2c   :  { %715 = vmatpush.bf16.msra.mxu2 %v1059_v15 }
  0x2d   :  { %633 = vmatpush.bf16.msrb.mxu3 %v1050_v4 }
  0x2e   :  { %525 = vmatpush.bf16.msrb.mxu0 %v1032_v47 }
  0x2f   :  { %538 = vmatpush.bf16.msrb.mxu1 %v1040_v48 }
  0x30   :  { %716 = vmatpush.bf16.msra.mxu2 %v1058_v18 }
  0x31   :  { %634 = vmatpush.bf16.msrb.mxu3 %v1049_v5 }
  0x32   :  { %526 = vmatpush.bf16.msrb.mxu0 %v1031_v49  ;;  %v1065_v49 = vld [vmem:[%s1216_s6] ss:$0 sm:$0xff] }
  0x33   :  { %539 = vmatpush.bf16.msrb.mxu1 %v1039_v50 }
  0x34   :  { %717 = vmatpush.bf16.msra.mxu2 %v1057_v20 }
  0x35   :  { %635 = vmatpush.bf16.msrb.mxu3 %v1048_v6 }
  0x36   :  { %527 = vmatpush.bf16.msrb.mxu0 %v1030_v52 }
  0x37   :  { %540 = vmatpush.bf16.msrb.mxu1 %v1038_v53  ;;  %930 = vmatmul.msk.bf16.vlgmr.msrb.gmra.mxu2 %vm467_vm0, %v166_v57 }
  0x38   :  { %718 = vmatpush.bf16.msra.mxu2 %v1056_v24 }
  0x39   :  { %636 = vmatpush.bf16.msrb.mxu3 %v1047_v7 }
  0x3a   :  { %528 = vmatpush.bf16.msrb.mxu0 %v1029_v55 }
  0x3b   :  { %541 = vmatpush.bf16.msrb.mxu1 %v1037_v56 }
  0x3c   :  { %719 = vmatpush.bf16.msra.mxu2 %v1055_v26 }
  0x3d   :  { %637 = vmatpush.bf16.msrb.mxu3 %v1046_v8 }
  0x3e   :  { %529 = vmatpush.bf16.msrb.mxu0 %v1028_v58 }
  0x3f   :  { %542 = vmatpush.bf16.msrb.mxu1 %v1036_v59 }
  0x40   :  { %720 = vmatpush.bf16.msra.mxu2 %v1054_v29 }
  0x41   :  { %638 = vmatpush.bf16.msrb.mxu3 %v1045_v9 }
  0x42   :  { %530 = vmatpush.bf16.msrb.mxu0 %v1027_v63 }
  0x43   :  { %543 = vmatpush.bf16.msrb.mxu1 %v1035_v0 }
  0x44   :  { %721 = vmatpush.bf16.msra.mxu2 %v1053_v41 }
  0x45   :  { %531 = vmatmul.bf16.vlgmr.msrb.gmra.mxu0 %v164_v1  ;;  %639 = vmatpush.bf16.msrb.mxu3 %v1044_v12 }
  0x46   :  { %544 = vmatmul.bf16.vlgmr.msrb.gmra.mxu1 %v165_v2 }
  0x48   :  { %722 = vmatpush.bf16.msra.mxu2 %v1052_v42 }
  0xa2   :  { %v480_v10 = vpop.f32.mrf.mxu0 }
  0xa3   :  { %v493_v11 = vpop.f32.mrf.mxu1  ;;  %v481_v21 = vadd.f32 %v1063_v19, %v480_v10 }
  0xa5   :  { %v494_v25 = vadd.f32 %v493_v11, %v481_v21 }
  0xaa   :  { %v482_v13 = vpop.f32.mrf.mxu0  ;;  %v506_v16 = vpop.f32.mrf.mxu2 }
  0xab   :  { %v495_v14 = vpop.f32.mrf.mxu1  ;;  %v519_v17 = vpop.f32.mrf.mxu3  ;;  %v507_v27 = vadd.f32 %v506_v16, %v494_v25 }
  0xad   :  { %v520_v30 = vadd.f32 %v519_v17, %v507_v27 }
  0xb2   :  { %v508_v22 = vpop.f32.mrf.mxu2 }
  0xb3   :  { %v521_v23 = vpop.f32.mrf.mxu3 }
  0xba   :  { %v558_v28 = vpop.f32.mrf.mxu2 }
  0xc2   :  { %v532_v31 = vpop.f32.mrf.mxu0  ;;  %v560_v35 = vpop.f32.mrf.mxu2 }
  0xc3   :  { %v545_v32 = vpop.f32.mrf.mxu1  ;;  %v533_v33 = vadd.f32 %v532_v31, %v520_v30 }
  0xc5   :  { %v546_v34 = vadd.f32 %v545_v32, %v533_v33 }
  0xc7   :  { %v559_v36 = vadd.f32 %v558_v28, %v546_v34 }
  0xc9   :  { %v562_v37 = vmax.f32 %v559_v36, 0.0 }
  0xca   :  { %v534_v38 = vpop.f32.mrf.mxu0 }
  0xcb   :  { %v547_v39 = vpop.f32.mrf.mxu1  ;;  %v563_v40 = vpack.c.bf16 %v562_v37, %v562_v37 }
  0xcd   :  { %640 = vmatmul.bf16.vlgmr.msrb.gmra.mxu3 %v563_v40 }
 0x150   :  { %v641_v44 = vpop.f32.mrf.mxu3 }
 0x151   :  { %v642_v45 = vadd.f32 %v1064_v43, %v641_v44 }
 0x153   :  { %v645_v46 = vmax.f32 %v642_v45, 0.0 }
 0x155   :  { %v646_v47 = vpack.c.bf16 %v645_v46, %v645_v46 }
 0x157   :  { %723 = vmatmul.bf16.vlgmr.msra.gmra.mxu2 %v646_v47 }
 0x158   :  { %v643_v48 = vpop.f32.mrf.mxu3 }
 0x1da   :  { %v724_v50 = vpop.f32.mrf.mxu2 }
 0x1db   :  { %v725_v51 = vadd.f32 %v1065_v49, %v724_v50 }
 0x1dd   :  { %728 = vst [vmem:[%s1217_s7] sm:$0xff] %v725_v51 }
 0x1e2   :  { %v726_v52 = vpop.f32.mrf.mxu2 }
 0x1e3   :  { %733 = vsyncpa [#allocation3], 1 }

</bundles_post_ra>
